<compile_context>
chip_gen: v6e
topology: v6e:2x2x1
jax: 0.10.0
libtpu: 0.0.40
codegen_flags: <defaults>
</compile_context>

<pallas_src>
import jax
import jax.numpy as jnp
from jax.experimental import pallas as pl
from jax.experimental.pallas import tpu as pltpu

EPS = 1e-5
NEG_SLOPE = 0.01     # nn.LeakyReLU default
LANE = 128           # lane padding width for all packed params


def _leaky(h):
    return jnp.where(h >= 0, h, NEG_SLOPE * h)


def _leaky_bn(h, gamma, beta, inv_b):
    """LeakyReLU + training-mode BatchNorm1d.

    Shifted one-pass statistics: d = h - h[0]; sum(d) and sum(d*d) are independent XLU
    reductions issued back-to-back, and the shift removes the E[h^2]-E[h]^2 cancellation
    risk of the plain one-pass form. Affine is pre-folded into (1,128) scale/shift so the
    (B,128) work is exactly one mul + one add; rsqrt runs on the EUP.
    """
    h = _leaky(h)
    off = h[0:1, :]                                 # (1, 128) per-feature shift
    d = h - off
    s = jnp.sum(d, axis=0, keepdims=True)           # (1, 128)
    ss = jnp.sum(d * d, axis=0, keepdims=True)      # (1, 128) — independent of s
    m = s * inv_b                                   # mean(h) - off
    var = ss * inv_b - m * m                        # biased variance of h (shift-invariant)
    scale = gamma * jax.lax.rsqrt(var + EPS)        # (1, 128), EUP rsqrt
    shift = beta - (off + m) * scale                # (1, 128)
    return h * scale + shift                        # one mul + one add over (B, 128)


def generator_kernel(x_ref, w_ref, p_ref, out_ref):
    B, n_z = x_ref.shape
    inv_b = jnp.float32(1.0 / B)

    x = x_ref[...]                                  # (B, N_z)
    p = p_ref[...]                                  # (8, 128)
    g1, b1 = p[0:1, :], p[1:2, :]
    g2, b2 = p[2:3, :], p[3:4, :]
    g3, b3 = p[4:5, :], p[5:6, :]
    bias4 = p[6:7, :]

    # Layer 1: Linear(N_z, 50, bias=False) -> LeakyReLU -> BatchNorm1d(50)
    w1 = w_ref[0][:n_z, :]                          # (N_z, 128) static sublane slice of the slab
    h = jnp.dot(x, w1, preferred_element_type=jnp.float32)          # (B, 128)
    h = _leaky_bn(h, g1, b1, inv_b)

    # Layer 2: Linear(50, 25, bias=False) -> LeakyReLU -> BatchNorm1d(25)
    h = jnp.dot(h, w_ref[1], preferred_element_type=jnp.float32)
    h = _leaky_bn(h, g2, b2, inv_b)

    # Layer 3: Linear(25, 11, bias=False) -> LeakyReLU -> BatchNorm1d(11)
    h = jnp.dot(h, w_ref[2], preferred_element_type=jnp.float32)
    h = _leaky_bn(h, g3, b3, inv_b)

    # Layer 4: Linear(11, 8) with bias
    h = jnp.dot(h, w_ref[3], preferred_element_type=jnp.float32) + bias4   # (B, 128)
    out_ref[...] = h[:, :out_ref.shape[1]]


def generator_forward(x, w_slab, p_slab):
    """x: (B, N_z) f32; w_slab: (4,128,128) f32; p_slab: (8,128) f32 (packed at init)."""
    B = x.shape[0]
    vmem_spec = pl.BlockSpec(memory_space=pltpu.MemorySpace.VMEM)
    # Gridless single block: total footprint ~0.26 MiB, far under VMEM on v5e/v6e/v7x.
    # NOTE: BN uses whole-batch statistics; if B ever grows large, switch to a two-pass
    # (stats + normalize) structure gridded over B with dimension_semantics=("parallel",)
    # to use both v7x TensorCores.
    return pl.pallas_call(
        generator_kernel,
        out_shape=jax.ShapeDtypeStruct((B, 8), jnp.float32),
        in_specs=[vmem_spec, vmem_spec, vmem_spec],
        out_specs=vmem_spec,
    )(x, w_slab, p_slab)


# ---------------------------------------------------------------------------
# Parameter construction / packing (host-side, once at init)
# ---------------------------------------------------------------------------

def init_params(key, n_z):
    """Deterministic synthetic init. Linear weights stored pre-transposed to (in, out);
    BatchNorm affine at PyTorch defaults (gamma=1, beta=0); final Linear bias = zeros."""
    k1, k2, k3, k4 = jax.random.split(key, 4)
    w1 = jax.random.normal(k1, (n_z, 50), jnp.float32) * 0.1
    w2 = jax.random.normal(k2, (50, 25), jnp.float32) * 0.1
    w3 = jax.random.normal(k3, (25, 11), jnp.float32) * 0.1
    w4 = jax.random.normal(k4, (11, 8), jnp.float32) * 0.1
    g1, b1 = jnp.ones((1, 50), jnp.float32), jnp.zeros((1, 50), jnp.float32)
    g2, b2 = jnp.ones((1, 25), jnp.float32), jnp.zeros((1, 25), jnp.float32)
    g3, b3 = jnp.ones((1, 11), jnp.float32), jnp.zeros((1, 11), jnp.float32)
    bias4 = jnp.zeros((1, 8), jnp.float32)
    return (w1, g1, b1, w2, g2, b2, w3, g3, b3, w4, bias4)


def pack_params(params):
    """Pack the 11 small params into two lane-padded slabs (done once at init time).
    Padded gamma lanes are ZERO (not one) so padded features stay exactly 0 through BN."""
    (w1, g1, b1, w2, g2, b2, w3, g3, b3, w4, bias4) = params

    def pad_w(w):
        out = jnp.zeros((LANE, LANE), jnp.float32)
        return out.at[:w.shape[0], :w.shape[1]].set(w)

    def pad_row(r):
        out = jnp.zeros((LANE,), jnp.float32)
        return out.at[:r.shape[-1]].set(r.reshape(-1))

    w_slab = jnp.stack([pad_w(w1), pad_w(w2), pad_w(w3), pad_w(w4)])        # (4, 128, 128)
    p_slab = jnp.stack([pad_row(g1), pad_row(b1),
                        pad_row(g2), pad_row(b2),
                        pad_row(g3), pad_row(b3),
                        pad_row(bias4),
                        jnp.zeros((LANE,), jnp.float32)])                   # (8, 128)
    return w_slab, p_slab


# ---------------------------------------------------------------------------
# Pure-JAX reference (two-pass BN, unpadded) for correctness checking
# ---------------------------------------------------------------------------

def _bn_ref(h, gamma, beta):
    mu = jnp.mean(h, axis=0, keepdims=True)
    var = jnp.mean((h - mu) * (h - mu), axis=0, keepdims=True)
    return (h - mu) * jax.lax.rsqrt(var + EPS) * gamma + beta


def reference_forward(x, params):
    (w1, g1, b1, w2, g2, b2, w3, g3, b3, w4, bias4) = params
    h = _bn_ref(_leaky(x @ w1), g1, b1)
    h = _bn_ref(_leaky(h @ w2), g2, b2)
    h = _bn_ref(_leaky(h @ w3), g3, b3)
    return h @ w4 + bias4


if __name__ == "__main__":
    N_z = 32
    B = 8
    key = jax.random.PRNGKey(0)
    kx, kp = jax.random.split(key)
    x = jax.random.normal(kx, (B, N_z), jnp.float32)

    params = init_params(kp, N_z)
    w_slab, p_slab = pack_params(params)          # one-time packing / lane padding
    w_slab = jax.block_until_ready(w_slab)
    p_slab = jax.block_until_ready(p_slab)

    out = generator_forward(x, w_slab, p_slab)
    out = jax.block_until_ready(out)

    ref = reference_forward(x, params)
    assert out.shape == (B, 8)
    assert jnp.allclose(out, ref, atol=1e-4, rtol=1e-4), "mismatch vs JAX reference"

    print("KERNEL_OK")
</pallas_src>

<mosaic_0001>
module attributes {stable_mosaic.version = 11 : i64} {
  func.func @generator_kernel(%arg0: memref<8x32xf32, #tpu.memory_space<vmem>>, %arg1: memref<4x128x128xf32, #tpu.memory_space<vmem>>, %arg2: memref<8x128xf32, #tpu.memory_space<vmem>>, %arg3: memref<8x8xf32, #tpu.memory_space<vmem>>) attributes {dimension_semantics = [], scalar_prefetch = 0 : i64, scratch_operands = 0 : i64, tpu.core_type = #tpu.core_type<tc>} {
    %c0 = arith.constant 0 : index
    %c0_0 = arith.constant 0 : index
    %0 = vector.load %arg0[%c0, %c0_0] : memref<8x32xf32, #tpu.memory_space<vmem>>, vector<8x32xf32>
    %c0_1 = arith.constant 0 : index
    %c0_2 = arith.constant 0 : index
    %1 = vector.load %arg2[%c0_1, %c0_2] : memref<8x128xf32, #tpu.memory_space<vmem>>, vector<8x128xf32>
    %2 = vector.extract_strided_slice %1 {offsets = [0, 0], sizes = [1, 128], strides = [1, 1]} : vector<8x128xf32> to vector<1x128xf32>
    %3 = vector.extract_strided_slice %1 {offsets = [1, 0], sizes = [1, 128], strides = [1, 1]} : vector<8x128xf32> to vector<1x128xf32>
    %4 = vector.extract_strided_slice %1 {offsets = [2, 0], sizes = [1, 128], strides = [1, 1]} : vector<8x128xf32> to vector<1x128xf32>
    %5 = vector.extract_strided_slice %1 {offsets = [3, 0], sizes = [1, 128], strides = [1, 1]} : vector<8x128xf32> to vector<1x128xf32>
    %6 = vector.extract_strided_slice %1 {offsets = [4, 0], sizes = [1, 128], strides = [1, 1]} : vector<8x128xf32> to vector<1x128xf32>
    %7 = vector.extract_strided_slice %1 {offsets = [5, 0], sizes = [1, 128], strides = [1, 1]} : vector<8x128xf32> to vector<1x128xf32>
    %8 = vector.extract_strided_slice %1 {offsets = [6, 0], sizes = [1, 128], strides = [1, 1]} : vector<8x128xf32> to vector<1x128xf32>
    %c0_3 = arith.constant 0 : index
    %c0_4 = arith.constant 0 : index
    %c0_5 = arith.constant 0 : index
    %9 = vector.load %arg1[%c0_3, %c0_4, %c0_5] : memref<4x128x128xf32, #tpu.memory_space<vmem>>, vector<1x128x128xf32>
    %10 = vector.shape_cast %9 : vector<1x128x128xf32> to vector<128x128xf32>
    %11 = vector.extract_strided_slice %10 {offsets = [0, 0], sizes = [32, 128], strides = [1, 1]} : vector<128x128xf32> to vector<32x128xf32>
    %cst = arith.constant dense<0.000000e+00> : vector<8x128xf32>
    %12 = tpu.matmul %0, %11, %cst {dimension_numbers = #tpu.dot_dimension_numbers<[1], [0], [0], [1], [0, 0, 1, 1], [], []>} : vector<8x32xf32>, vector<32x128xf32>, vector<8x128xf32> -> vector<8x128xf32>
    %cst_6 = arith.constant 0.000000e+00 : f32
    %13 = vector.broadcast %cst_6 : f32 to vector<8x128xf32>
    %14 = arith.cmpf oge, %12, %13 : vector<8x128xf32>
    %cst_7 = arith.constant 0.00999999977 : f32
    %15 = vector.broadcast %cst_7 : f32 to vector<8x128xf32>
    %16 = arith.mulf %15, %12 : vector<8x128xf32>
    %17 = arith.select %14, %12, %16 : vector<8x128xi1>, vector<8x128xf32>
    %18 = vector.extract_strided_slice %17 {offsets = [0, 0], sizes = [1, 128], strides = [1, 1]} : vector<8x128xf32> to vector<1x128xf32>
    %19 = vector.broadcast %18 : vector<1x128xf32> to vector<8x128xf32>
    %20 = arith.subf %17, %19 : vector<8x128xf32>
    %cst_8 = arith.constant dense<0.000000e+00> : vector<128xf32>
    %21 = vector.multi_reduction <add>, %20, %cst_8 [0] : vector<8x128xf32> to vector<128xf32>
    %22 = vector.shape_cast %21 : vector<128xf32> to vector<1x128xf32>
    %23 = arith.mulf %20, %20 : vector<8x128xf32>
    %cst_9 = arith.constant dense<0.000000e+00> : vector<128xf32>
    %24 = vector.multi_reduction <add>, %23, %cst_9 [0] : vector<8x128xf32> to vector<128xf32>
    %25 = vector.shape_cast %24 : vector<128xf32> to vector<1x128xf32>
    %cst_10 = arith.constant 1.250000e-01 : f32
    %26 = vector.broadcast %cst_10 : f32 to vector<1x128xf32>
    %27 = arith.mulf %22, %26 : vector<1x128xf32>
    %cst_11 = arith.constant 1.250000e-01 : f32
    %28 = vector.broadcast %cst_11 : f32 to vector<1x128xf32>
    %29 = arith.mulf %25, %28 : vector<1x128xf32>
    %30 = arith.mulf %27, %27 : vector<1x128xf32>
    %31 = arith.subf %29, %30 : vector<1x128xf32>
    %cst_12 = arith.constant 9.99999974E-6 : f32
    %32 = vector.broadcast %cst_12 : f32 to vector<1x128xf32>
    %33 = arith.addf %31, %32 : vector<1x128xf32>
    %34 = math.rsqrt %33 : vector<1x128xf32>
    %35 = arith.mulf %2, %34 : vector<1x128xf32>
    %36 = arith.addf %18, %27 : vector<1x128xf32>
    %37 = arith.mulf %36, %35 : vector<1x128xf32>
    %38 = arith.subf %3, %37 : vector<1x128xf32>
    %39 = vector.broadcast %35 : vector<1x128xf32> to vector<8x128xf32>
    %40 = arith.mulf %17, %39 : vector<8x128xf32>
    %41 = vector.broadcast %38 : vector<1x128xf32> to vector<8x128xf32>
    %42 = arith.addf %40, %41 : vector<8x128xf32>
    %c1 = arith.constant 1 : index
    %c0_13 = arith.constant 0 : index
    %c0_14 = arith.constant 0 : index
    %43 = vector.load %arg1[%c1, %c0_13, %c0_14] : memref<4x128x128xf32, #tpu.memory_space<vmem>>, vector<1x128x128xf32>
    %44 = vector.shape_cast %43 : vector<1x128x128xf32> to vector<128x128xf32>
    %cst_15 = arith.constant dense<0.000000e+00> : vector<8x128xf32>
    %45 = tpu.matmul %42, %44, %cst_15 {dimension_numbers = #tpu.dot_dimension_numbers<[1], [0], [0], [1], [0, 0, 1, 1], [], []>} : vector<8x128xf32>, vector<128x128xf32>, vector<8x128xf32> -> vector<8x128xf32>
    %cst_16 = arith.constant 0.000000e+00 : f32
    %46 = vector.broadcast %cst_16 : f32 to vector<8x128xf32>
    %47 = arith.cmpf oge, %45, %46 : vector<8x128xf32>
    %cst_17 = arith.constant 0.00999999977 : f32
    %48 = vector.broadcast %cst_17 : f32 to vector<8x128xf32>
    %49 = arith.mulf %48, %45 : vector<8x128xf32>
    %50 = arith.select %47, %45, %49 : vector<8x128xi1>, vector<8x128xf32>
    %51 = vector.extract_strided_slice %50 {offsets = [0, 0], sizes = [1, 128], strides = [1, 1]} : vector<8x128xf32> to vector<1x128xf32>
    %52 = vector.broadcast %51 : vector<1x128xf32> to vector<8x128xf32>
    %53 = arith.subf %50, %52 : vector<8x128xf32>
    %cst_18 = arith.constant dense<0.000000e+00> : vector<128xf32>
    %54 = vector.multi_reduction <add>, %53, %cst_18 [0] : vector<8x128xf32> to vector<128xf32>
    %55 = vector.shape_cast %54 : vector<128xf32> to vector<1x128xf32>
    %56 = arith.mulf %53, %53 : vector<8x128xf32>
    %cst_19 = arith.constant dense<0.000000e+00> : vector<128xf32>
    %57 = vector.multi_reduction <add>, %56, %cst_19 [0] : vector<8x128xf32> to vector<128xf32>
    %58 = vector.shape_cast %57 : vector<128xf32> to vector<1x128xf32>
    %cst_20 = arith.constant 1.250000e-01 : f32
    %59 = vector.broadcast %cst_20 : f32 to vector<1x128xf32>
    %60 = arith.mulf %55, %59 : vector<1x128xf32>
    %cst_21 = arith.constant 1.250000e-01 : f32
    %61 = vector.broadcast %cst_21 : f32 to vector<1x128xf32>
    %62 = arith.mulf %58, %61 : vector<1x128xf32>
    %63 = arith.mulf %60, %60 : vector<1x128xf32>
    %64 = arith.subf %62, %63 : vector<1x128xf32>
    %cst_22 = arith.constant 9.99999974E-6 : f32
    %65 = vector.broadcast %cst_22 : f32 to vector<1x128xf32>
    %66 = arith.addf %64, %65 : vector<1x128xf32>
    %67 = math.rsqrt %66 : vector<1x128xf32>
    %68 = arith.mulf %4, %67 : vector<1x128xf32>
    %69 = arith.addf %51, %60 : vector<1x128xf32>
    %70 = arith.mulf %69, %68 : vector<1x128xf32>
    %71 = arith.subf %5, %70 : vector<1x128xf32>
    %72 = vector.broadcast %68 : vector<1x128xf32> to vector<8x128xf32>
    %73 = arith.mulf %50, %72 : vector<8x128xf32>
    %74 = vector.broadcast %71 : vector<1x128xf32> to vector<8x128xf32>
    %75 = arith.addf %73, %74 : vector<8x128xf32>
    %c2 = arith.constant 2 : index
    %c0_23 = arith.constant 0 : index
    %c0_24 = arith.constant 0 : index
    %76 = vector.load %arg1[%c2, %c0_23, %c0_24] : memref<4x128x128xf32, #tpu.memory_space<vmem>>, vector<1x128x128xf32>
    %77 = vector.shape_cast %76 : vector<1x128x128xf32> to vector<128x128xf32>
    %cst_25 = arith.constant dense<0.000000e+00> : vector<8x128xf32>
    %78 = tpu.matmul %75, %77, %cst_25 {dimension_numbers = #tpu.dot_dimension_numbers<[1], [0], [0], [1], [0, 0, 1, 1], [], []>} : vector<8x128xf32>, vector<128x128xf32>, vector<8x128xf32> -> vector<8x128xf32>
    %cst_26 = arith.constant 0.000000e+00 : f32
    %79 = vector.broadcast %cst_26 : f32 to vector<8x128xf32>
    %80 = arith.cmpf oge, %78, %79 : vector<8x128xf32>
    %cst_27 = arith.constant 0.00999999977 : f32
    %81 = vector.broadcast %cst_27 : f32 to vector<8x128xf32>
    %82 = arith.mulf %81, %78 : vector<8x128xf32>
    %83 = arith.select %80, %78, %82 : vector<8x128xi1>, vector<8x128xf32>
    %84 = vector.extract_strided_slice %83 {offsets = [0, 0], sizes = [1, 128], strides = [1, 1]} : vector<8x128xf32> to vector<1x128xf32>
    %85 = vector.broadcast %84 : vector<1x128xf32> to vector<8x128xf32>
    %86 = arith.subf %83, %85 : vector<8x128xf32>
    %cst_28 = arith.constant dense<0.000000e+00> : vector<128xf32>
    %87 = vector.multi_reduction <add>, %86, %cst_28 [0] : vector<8x128xf32> to vector<128xf32>
    %88 = vector.shape_cast %87 : vector<128xf32> to vector<1x128xf32>
    %89 = arith.mulf %86, %86 : vector<8x128xf32>
    %cst_29 = arith.constant dense<0.000000e+00> : vector<128xf32>
    %90 = vector.multi_reduction <add>, %89, %cst_29 [0] : vector<8x128xf32> to vector<128xf32>
    %91 = vector.shape_cast %90 : vector<128xf32> to vector<1x128xf32>
    %cst_30 = arith.constant 1.250000e-01 : f32
    %92 = vector.broadcast %cst_30 : f32 to vector<1x128xf32>
    %93 = arith.mulf %88, %92 : vector<1x128xf32>
    %cst_31 = arith.constant 1.250000e-01 : f32
    %94 = vector.broadcast %cst_31 : f32 to vector<1x128xf32>
    %95 = arith.mulf %91, %94 : vector<1x128xf32>
    %96 = arith.mulf %93, %93 : vector<1x128xf32>
    %97 = arith.subf %95, %96 : vector<1x128xf32>
    %cst_32 = arith.constant 9.99999974E-6 : f32
    %98 = vector.broadcast %cst_32 : f32 to vector<1x128xf32>
    %99 = arith.addf %97, %98 : vector<1x128xf32>
    %100 = math.rsqrt %99 : vector<1x128xf32>
    %101 = arith.mulf %6, %100 : vector<1x128xf32>
    %102 = arith.addf %84, %93 : vector<1x128xf32>
    %103 = arith.mulf %102, %101 : vector<1x128xf32>
    %104 = arith.subf %7, %103 : vector<1x128xf32>
    %105 = vector.broadcast %101 : vector<1x128xf32> to vector<8x128xf32>
    %106 = arith.mulf %83, %105 : vector<8x128xf32>
    %107 = vector.broadcast %104 : vector<1x128xf32> to vector<8x128xf32>
    %108 = arith.addf %106, %107 : vector<8x128xf32>
    %c3 = arith.constant 3 : index
    %c0_33 = arith.constant 0 : index
    %c0_34 = arith.constant 0 : index
    %109 = vector.load %arg1[%c3, %c0_33, %c0_34] : memref<4x128x128xf32, #tpu.memory_space<vmem>>, vector<1x128x128xf32>
    %110 = vector.shape_cast %109 : vector<1x128x128xf32> to vector<128x128xf32>
    %cst_35 = arith.constant dense<0.000000e+00> : vector<8x128xf32>
    %111 = tpu.matmul %108, %110, %cst_35 {dimension_numbers = #tpu.dot_dimension_numbers<[1], [0], [0], [1], [0, 0, 1, 1], [], []>} : vector<8x128xf32>, vector<128x128xf32>, vector<8x128xf32> -> vector<8x128xf32>
    %112 = vector.broadcast %8 : vector<1x128xf32> to vector<8x128xf32>
    %113 = arith.addf %111, %112 : vector<8x128xf32>
    %114 = vector.extract_strided_slice %113 {offsets = [0, 0], sizes = [8, 8], strides = [1, 1]} : vector<8x128xf32> to vector<8x8xf32>
    %c0_36 = arith.constant 0 : index
    %c0_37 = arith.constant 0 : index
    %115 = vector.load %arg3[%c0_36, %c0_37] : memref<8x8xf32, #tpu.memory_space<vmem>>, vector<8x8xf32>
    tpu.vector_store %arg3[%c0_36, %c0_37], %114 {strides = array<i32>} : memref<8x8xf32, #tpu.memory_space<vmem>>, vector<8x8xf32>,
    return
  }
}

</mosaic_0001>

<bundles_post_ra>
// kernel: tpu_custom_call.1
= control target key start
LH: loop header
LB: loop body
LE: loop exit
PB: predicated region body
PF: predicated region fallthrough
CT: control target
= control target key end

     0   :  { %8 = vsyncpa [#allocation3], 0  ;;  %s950_s0 = inlined_call_operand.hbm [shape: f32[8,32], index: 0, kind: input, shape index: {}]   ;;  %s951_s1 = inlined_call_operand.hbm [shape: f32[4,128,128], index: 1, kind: input, shape index: {}]   ;;  %s952_s2 = inlined_call_operand.hbm [shape: f32[8,128], index: 2, kind: input, shape index: {}]   ;;  %s953_s3 = inlined_call_operand.hbm [shape: f32[8,8], index: 3, kind: output, shape index: {}]  }
   0x1   :  { %9 = vsyncpa [#allocation6], 0 }
   0x2   :  { %10 = vsyncpa [#allocation4], 0  ;;  %s826_s12 = smov [#allocation5]  }
   0x3   :  { %s26_s13 = sshll.u32 %s826_s12, 4  ;;  %s27_s13 = int_to_ptr.vmem [resolvable:$true] %s26_s13 }
   0x4   :  { %s748_s14 = scalar_lea.vmem %s27_s13, 8192  ;;  %p753_p1 = scmp.lt.s32.totalorder %s27_s13, %s27_s13 }
   0x5   :  { %p749_p0 = scmp.ne.s32.totalorder %s27_s13, %s748_s14  ;;  %p754_p2 = scmp.lt.s32.totalorder %s748_s14, %s748_s14 }
   0x7   :  { %p755_p3 = por %p754_p2, %p753_p1 }
   0x9   :  { %p756_p4 = pnand %p755_p3, %p749_p0 }
   0xb   :  { %759 = shalt.err (!%p756_p4)
}
   0xc   :  { %s827_s15 = smov 128   ;;  %s828_s16 = smov 8  }
   0xd   :  { %32 = dma.hbm_to_vmem [thread:$0]  %s951_s1, 8192, %s27_s13, [#allocation6], %s827_s15, %s827_s15, %s828_s16  }
   0xe   :  { %s829_s19 = smov [#allocation2]   ;;  %s830_s21 = smov [#allocation7]  }
   0xf   :  { %s17_s20 = sshll.u32 %s829_s19, 4  ;;  %s39_s22 = sshll.u32 %s830_s21, 4  ;;  %s18_s20 = int_to_ptr.vmem [resolvable:$true] %s17_s20  ;;  %s40_s22 = int_to_ptr.vmem [resolvable:$true] %s39_s22 }
  0x10   :  { %s768_s23 = scalar_lea.vmem %s18_s20, 128  ;;  %p773_p6 = scmp.lt.s32.totalorder %s18_s20, %s18_s20 }
  0x11   :  { %p769_p5 = scmp.ne.s32.totalorder %s18_s20, %s768_s23  ;;  %p774_p7 = scmp.lt.s32.totalorder %s768_s23, %s768_s23 }
  0x13   :  { %p775_p8 = por %p774_p7, %p773_p6 }
  0x15   :  { %p776_p9 = pnand %p775_p8, %p769_p5 }
  0x17   :  { %779 = shalt.err (!%p776_p9)
}
  0x18   :  { %20 = dma.hbm_to_vmem [thread:$0]  %s950_s0, 128, %s18_s20, [#allocation3]  }
  0x19   :  { %s788_s26 = scalar_lea.vmem %s40_s22, 128  ;;  %p793_p11 = scmp.lt.s32.totalorder %s40_s22, %s40_s22 }
  0x1a   :  { %p789_p10 = scmp.ne.s32.totalorder %s40_s22, %s788_s26  ;;  %p794_p12 = scmp.lt.s32.totalorder %s788_s26, %s788_s26 }
  0x1c   :  { %p795_p13 = por %p794_p12, %p793_p11 }
  0x1e   :  { %p796_p0 = pnand %p795_p13, %p789_p10 }
  0x20   :  { %799 = shalt.err (!%p796_p0)
}
  0x21   :  { %42 = dma.hbm_to_vmem [thread:$0]  %s952_s2, 128, %s40_s22, [#allocation6]  }
  0x22   :  { %820 = dma.done.wait [#allocation3], 128  }
  0x23   :  { %821 = vsyncadd [#allocation3], 4294967168 }
  0x24   :  { %822 = dma.done.wait [#allocation6], 8320  }
  0x25   :  { %823 = vsyncadd [#allocation6], 4294958976  ;;  %v831_v0 = vmov 0.0   ;;  %vm832_vm0 = vmmov 0   ;;  %v57_v1 = vld [vmem:[#allocation5 + $0x18] sm:$0xff]  ;;  %v56_v2 = vld [vmem:[#allocation5 + $0x10] sm:$0xff]  ;;  %v135_v22 = vlaneseq }
  0x26   :  { %610 = vmatprep.subr.mxu0 %v831_v0  ;;  %618 = vmatprep.mubr.msk.f32.mxu0 %vm832_vm0, %v831_v0  ;;  %v55_v3 = vld [vmem:[#allocation5 + $0x8] sm:$0xff]  ;;  %v54_v4 = vld [vmem:[#allocation5] sm:$0xff]  ;;  %v52_v5 = vld [vmem:[#allocation2] sm:$0xff]  ;;  %vm58_vm1 = vcmask 261120   ;;  %s833_s0 = smov [#allocation8]   ;;  %vm535_vm5 = vcmask 64512  }
  0x27   :  { %621 = vmatprep.subr.mxu1 %v831_v0  ;;  %653 = vmatprep.mubr.msk.f32.mxu1 %vm832_vm0, %v831_v0  ;;  %v192_v6 = vld [vmem:[#allocation5 + $0xf8] sm:$0xff]  ;;  %v191_v7 = vld [vmem:[#allocation5 + $0xf0] sm:$0xff]  ;;  %v190_v8 = vld [vmem:[#allocation5 + $0xe8] sm:$0xff]  ;;  %v891_v23 = vshrl.u32 %v135_v22, 7  ;;  %s543_s2 = sshll.u32 %s833_s0, 4  ;;  %s544_s2 = int_to_ptr.vmem [resolvable:$true] %s543_s2 }
  0x28   :  { %611 = vmatpush3.msra.mxu0 %v57_v1  ;;  %622 = vmatpush3.msra.mxu1 %v192_v6  ;;  %v189_v9 = vld [vmem:[#allocation5 + $0xe0] sm:$0xff]  ;;  %v188_v10 = vld [vmem:[#allocation5 + $0xd8] sm:$0xff]  ;;  %v187_v11 = vld [vmem:[#allocation5 + $0xd0] sm:$0xff]  ;;  %s800_s28 = scalar_lea.vmem %s544_s2, 128  ;;  %p805_p2 = scmp.lt.s32.totalorder %s544_s2, %s544_s2 }
  0x29   :  { %612 = vmatprep.subr.mxu0 %v831_v0  ;;  %623 = vmatprep.subr.mxu1 %v831_v0  ;;  %v186_v12 = vld [vmem:[#allocation5 + $0xc8] sm:$0xff]  ;;  %v185_v13 = vld [vmem:[#allocation5 + $0xc0] sm:$0xff]  ;;  %v184_v14 = vld [vmem:[#allocation5 + $0xb8] sm:$0xff]  ;;  %v894_v25 = vsub.s32 0, %v891_v23  ;;  %v173_v56 = vsub.s32 1, %v891_v23  ;;  %p801_p1 = scmp.ne.s32.totalorder %s544_s2, %s800_s28  ;;  %p806_p3 = scmp.lt.s32.totalorder %s800_s28, %s800_s28 }
  0x2a   :  { %613 = vmatpush3.msra.mxu0 %v56_v2  ;;  %624 = vmatpush3.msra.mxu1 %v191_v7  ;;  %v183_v15 = vld [vmem:[#allocation5 + $0xb0] sm:$0xff]  ;;  %v182_v16 = vld [vmem:[#allocation5 + $0xa8] sm:$0xff]  ;;  %v181_v17 = vld [vmem:[#allocation5 + $0xa0] sm:$0xff] }
  0x2b   :  { %614 = vmatprep.subr.mxu0 %v831_v0  ;;  %625 = vmatprep.subr.mxu1 %v831_v0  ;;  %v180_v18 = vld [vmem:[#allocation5 + $0x98] sm:$0xff]  ;;  %v179_v19 = vld [vmem:[#allocation5 + $0x90] sm:$0xff]  ;;  %v178_v20 = vld [vmem:[#allocation5 + $0x88] sm:$0xff]  ;;  %p807_p4 = por %p806_p3, %p805_p2 }
  0x2c   :  { %615 = vmatpush3.msra.mxu0 %v55_v3  ;;  %626 = vmatpush3.msra.mxu1 %v190_v8  ;;  %v177_v21 = vld [vmem:[#allocation5 + $0x80] sm:$0xff]  ;;  %v326_v61 = vld [vmem:[#allocation5 + $0x178] sm:$0xff]  ;;  %v325_v62 = vld [vmem:[#allocation5 + $0x170] sm:$0xff] }
  0x2d   :  { %616 = vmatprep.subr.mxu0 %v831_v0  ;;  %627 = vmatprep.subr.mxu1 %v831_v0  ;;  %v897_v49 = vld [vmem:[#allocation7] sm:$0xff]  ;;  %v324_v63 = vld [vmem:[#allocation5 + $0x168] sm:$0xff]  ;;  %v322_v2 = vld [vmem:[#allocation5 + $0x158] sm:$0xff]  ;;  %p808_p5 = pnand %p807_p4, %p801_p1 }
  0x2e   :  { %617 = vmatpush3.msra.mxu0 %v54_v4  ;;  %628 = vmatpush3.msra.mxu1 %v189_v9  ;;  %v323_v1 = vld [vmem:[#allocation5 + $0x160] sm:$0xff]  ;;  %v321_v3 = vld [vmem:[#allocation5 + $0x150] sm:$0xff]  ;;  %v320_v4 = vld [vmem:[#allocation5 + $0x148] sm:$0xff] }
  0x2f   :  { %619 = vmatmul.mubr.msk.f32.vlgmr.msra.gmra.mxu0 %vm58_vm1, %v52_v5  ;;  %656 = vmatprep.subr.mxu0 %v831_v0  ;;  %v319_v5 = vld [vmem:[#allocation5 + $0x140] sm:$0xff]  ;;  %v318_v6 = vld [vmem:[#allocation5 + $0x138] sm:$0xff]  ;;  %v317_v7 = vld [vmem:[#allocation5 + $0x130] sm:$0xff] }
  0x30   :  { %688 = vmatprep.mubr.msk.f32.mxu0 %vm832_vm0, %v831_v0  ;;  %629 = vmatprep.subr.mxu1 %v831_v0  ;;  %v316_v8 = vld [vmem:[#allocation5 + $0x128] sm:$0xff]  ;;  %v315_v9 = vld [vmem:[#allocation5 + $0x120] sm:$0xff] }
  0x31   :  { %630 = vmatpush3.msra.mxu1 %v188_v10  ;;  %657 = vmatpush3.msra.mxu0 %v326_v61  ;;  %v314_v10 = vld [vmem:[#allocation5 + $0x118] sm:$0xff]  ;;  %v453_v61 = vld [vmem:[#allocation5 + $0x1c0] sm:$0xff] }
  0x32   :  { %631 = vmatprep.subr.mxu1 %v831_v0  ;;  %658 = vmatprep.subr.mxu0 %v831_v0 }
  0x33   :  { %632 = vmatpush3.msra.mxu1 %v187_v11  ;;  %659 = vmatpush3.msra.mxu0 %v325_v62  ;;  %v313_v11 = vld [vmem:[#allocation5 + $0x110] sm:$0xff]  ;;  %v452_v62 = vld [vmem:[#allocation5 + $0x1b8] sm:$0xff] }
  0x34   :  { %633 = vmatprep.subr.mxu1 %v831_v0  ;;  %660 = vmatprep.subr.mxu0 %v831_v0 }
  0x35   :  { %634 = vmatpush3.msra.mxu1 %v186_v12  ;;  %661 = vmatpush3.msra.mxu0 %v324_v63  ;;  %v312_v12 = vld [vmem:[#allocation5 + $0x108] sm:$0xff]  ;;  %v451_v63 = vld [vmem:[#allocation5 + $0x1b0] sm:$0xff] }
  0x36   :  { %635 = vmatprep.subr.mxu1 %v831_v0  ;;  %662 = vmatprep.subr.mxu0 %v831_v0 }
  0x37   :  { %636 = vmatpush3.msra.mxu1 %v185_v13  ;;  %663 = vmatpush3.msra.mxu0 %v323_v1  ;;  %v311_v13 = vld [vmem:[#allocation5 + $0x100] sm:$0xff]  ;;  %v450_v1 = vld [vmem:[#allocation5 + $0x1a8] sm:$0xff] }
  0x38   :  { %637 = vmatprep.subr.mxu1 %v831_v0  ;;  %664 = vmatprep.subr.mxu0 %v831_v0 }
  0x39   :  { %638 = vmatpush3.msra.mxu1 %v184_v14  ;;  %665 = vmatpush3.msra.mxu0 %v322_v2  ;;  %v449_v2 = vld [vmem:[#allocation5 + $0x1a0] sm:$0xff] }
  0x3a   :  { %639 = vmatprep.subr.mxu1 %v831_v0  ;;  %666 = vmatprep.subr.mxu0 %v831_v0 }
  0x3b   :  { %640 = vmatpush3.msra.mxu1 %v183_v15  ;;  %667 = vmatpush3.msra.mxu0 %v321_v3  ;;  %v448_v3 = vld [vmem:[#allocation5 + $0x198] sm:$0xff] }
  0x3c   :  { %641 = vmatprep.subr.mxu1 %v831_v0  ;;  %668 = vmatprep.subr.mxu0 %v831_v0 }
  0x3d   :  { %642 = vmatpush3.msra.mxu1 %v182_v16  ;;  %669 = vmatpush3.msra.mxu0 %v320_v4  ;;  %v447_v4 = vld [vmem:[#allocation5 + $0x190] sm:$0xff] }
  0x3e   :  { %643 = vmatprep.subr.mxu1 %v831_v0  ;;  %670 = vmatprep.subr.mxu0 %v831_v0 }
  0x3f   :  { %644 = vmatpush3.msra.mxu1 %v181_v17  ;;  %671 = vmatpush3.msra.mxu0 %v319_v5  ;;  %v446_v5 = vld [vmem:[#allocation5 + $0x188] sm:$0xff] }
  0x40   :  { %645 = vmatprep.subr.mxu1 %v831_v0  ;;  %672 = vmatprep.subr.mxu0 %v831_v0 }
  0x41   :  { %646 = vmatpush3.msra.mxu1 %v180_v18  ;;  %673 = vmatpush3.msra.mxu0 %v318_v6  ;;  %v445_v6 = vld [vmem:[#allocation5 + $0x180] sm:$0xff] }
  0x42   :  { %647 = vmatprep.subr.mxu1 %v831_v0  ;;  %674 = vmatprep.subr.mxu0 %v831_v0 }
  0x43   :  { %648 = vmatpush3.msra.mxu1 %v179_v19  ;;  %675 = vmatpush3.msra.mxu0 %v317_v7 }
  0x44   :  { %649 = vmatprep.subr.mxu1 %v831_v0  ;;  %676 = vmatprep.subr.mxu0 %v831_v0 }
  0x45   :  { %650 = vmatpush3.msra.mxu1 %v178_v20  ;;  %677 = vmatpush3.msra.mxu0 %v316_v8 }
  0x46   :  { %651 = vmatprep.subr.mxu1 %v831_v0  ;;  %678 = vmatprep.subr.mxu0 %v831_v0 }
  0x47   :  { %652 = vmatpush3.msra.mxu1 %v177_v21  ;;  %679 = vmatpush3.msra.mxu0 %v315_v9 }
  0x48   :  { %691 = vmatprep.subr.mxu1 %v831_v0  ;;  %680 = vmatprep.subr.mxu0 %v831_v0 }
  0x49   :  { %681 = vmatpush3.msra.mxu0 %v314_v10 }
  0x4a   :  { %682 = vmatprep.subr.mxu0 %v831_v0 }
  0x4b   :  { %683 = vmatpush3.msra.mxu0 %v313_v11 }
  0x4c   :  { %684 = vmatprep.subr.mxu0 %v831_v0 }
  0x4d   :  { %685 = vmatpush3.msra.mxu0 %v312_v12 }
  0x4e   :  { %686 = vmatprep.subr.mxu0 %v831_v0 }
  0x4f   :  { %687 = vmatpush3.msra.mxu0 %v311_v13 }
  0xef   :  { %v128_v24 = vpop.f32.mrf.mxu0 }
  0xf0   :  { %vm132_vm2 = vcmp.ge.f32.partialorder %v128_v24, 0.0  ;;  %v133_v26 = vmul.f32 0.01, %v128_v24 }
  0xf1   :  { %v620_v27 = vpop.f32.mrf.mxu0 }
  0xf2   :  { %v134_v28 = vsel %vm132_vm2, %v128_v24, %v133_v26 }
  0xf3   :  { %v138_v29 = vrot.slane %v134_v28, %v894_v25 }
  0xf5   :  { %v139_v30 = vsub.f32 %v134_v28, %v138_v29 }
  0xf7   :  { %v140_v31 = vrot.slane %v139_v30, 4  ;;  %v146_v32 = vmul.f32 %v139_v30, %v139_v30 }
  0xf9   :  { %v141_v33 = vadd.f32 %v140_v31, %v139_v30  ;;  %v147_v34 = vrot.slane %v146_v32, 4 }
  0xfb   :  { %v142_v35 = vrot.slane %v141_v33, 2  ;;  %v148_v36 = vadd.f32 %v147_v34, %v146_v32 }
  0xfd   :  { %v143_v37 = vadd.f32 %v142_v35, %v141_v33  ;;  %v149_v38 = vrot.slane %v148_v36, 2 }
  0xff   :  { %v144_v39 = vrot.slane %v143_v37, 1  ;;  %v150_v40 = vadd.f32 %v149_v38, %v148_v36 }
 0x101   :  { %v145_v41 = vadd.f32 %v144_v39, %v143_v37  ;;  %v151_v42 = vrot.slane %v150_v40, 1 }
 0x103   :  { %v152_v43 = vadd.f32 %v151_v42, %v150_v40  ;;  %v153_v44 = vmul.f32 0.125, %v145_v41 }
 0x105   :  { %v154_v45 = vmul.f32 0.125, %v152_v43  ;;  %v155_v46 = vmul.f32 %v153_v44, %v153_v44  ;;  %v160_v52 = vadd.f32 %v153_v44, %v134_v28  ;;  %v302_v44 = vsub.s32 2, %v891_v23 }
 0x107   :  { %v156_v47 = vsub.f32 %v154_v45, %v155_v46 }
 0x109   :  { %v157_v48 = vadd.f32 1e-05, %v156_v47 }
 0x10b   :  { %734 = vrsqrt.f32 %v157_v48  ;;  %v307_v48 = vsub.s32 3, %v891_v23 }
 0x118   :  { %v735_v50 = vpop.eup %734 }
 0x119   :  { %v159_v51 = vmul.f32 %v735_v50, %v897_v49 }
 0x11b   :  { %v161_v53 = vmul.f32 %v160_v52, %v159_v51  ;;  %v169_v55 = vrot.slane %v159_v51, %v894_v25 }
 0x11d   :  { %v163_v54 = vrot.slane %v161_v53, 7  ;;  %v170_v58 = vmul.f32 %v169_v55, %v134_v28  ;;  %v459_v55 = vld [vmem:[#allocation5 + $0x1f0] sm:$0xff] }
 0x11f   :  { %v165_v57 = vsub.f32 %v897_v49, %v163_v54  ;;  %v460_v54 = vld [vmem:[#allocation5 + $0x1f8] sm:$0xff] }
 0x121   :  { %v174_v59 = vrot.slane %v165_v57, %v173_v56  ;;  %v458_v56 = vld [vmem:[#allocation5 + $0x1e8] sm:$0xff]  ;;  %v457_v57 = vld [vmem:[#allocation5 + $0x1e0] sm:$0xff] }
 0x123   :  { %v175_v60 = vadd.f32 %v174_v59, %v170_v58  ;;  %v456_v58 = vld [vmem:[#allocation5 + $0x1d8] sm:$0xff]  ;;  %v455_v59 = vld [vmem:[#allocation5 + $0x1d0] sm:$0xff] }
 0x125   :  { %654 = vmatmul.mubr.f32.vlgmr.msra.gmra.mxu1 %v175_v60  ;;  %v454_v60 = vld [vmem:[#allocation5 + $0x1c8] sm:$0xff] }
 0x126   :  { %723 = vmatprep.mubr.msk.f32.mxu1 %vm832_vm0, %v831_v0  ;;  %692 = vmatpush3.msra.mxu1 %v460_v54 }
 0x127   :  { %693 = vmatprep.subr.mxu1 %v831_v0 }
 0x128   :  { %694 = vmatpush3.msra.mxu1 %v459_v55 }
 0x129   :  { %695 = vmatprep.subr.mxu1 %v831_v0 }
 0x12a   :  { %696 = vmatpush3.msra.mxu1 %v458_v56 }
 0x12b   :  { %697 = vmatprep.subr.mxu1 %v831_v0 }
 0x12c   :  { %698 = vmatpush3.msra.mxu1 %v457_v57 }
 0x12d   :  { %699 = vmatprep.subr.mxu1 %v831_v0 }
 0x12e   :  { %700 = vmatpush3.msra.mxu1 %v456_v58 }
 0x12f   :  { %701 = vmatprep.subr.mxu1 %v831_v0 }
 0x130   :  { %702 = vmatpush3.msra.mxu1 %v455_v59 }
 0x131   :  { %703 = vmatprep.subr.mxu1 %v831_v0 }
 0x132   :  { %704 = vmatpush3.msra.mxu1 %v454_v60 }
 0x133   :  { %705 = vmatprep.subr.mxu1 %v831_v0 }
 0x134   :  { %706 = vmatpush3.msra.mxu1 %v453_v61 }
 0x135   :  { %707 = vmatprep.subr.mxu1 %v831_v0 }
 0x136   :  { %708 = vmatpush3.msra.mxu1 %v452_v62 }
 0x137   :  { %709 = vmatprep.subr.mxu1 %v831_v0 }
 0x138   :  { %710 = vmatpush3.msra.mxu1 %v451_v63 }
 0x139   :  { %711 = vmatprep.subr.mxu1 %v831_v0 }
 0x13a   :  { %712 = vmatpush3.msra.mxu1 %v450_v1 }
 0x13b   :  { %713 = vmatprep.subr.mxu1 %v831_v0 }
 0x13c   :  { %714 = vmatpush3.msra.mxu1 %v449_v2 }
 0x13d   :  { %715 = vmatprep.subr.mxu1 %v831_v0 }
 0x13e   :  { %716 = vmatpush3.msra.mxu1 %v448_v3 }
 0x13f   :  { %717 = vmatprep.subr.mxu1 %v831_v0 }
 0x140   :  { %718 = vmatpush3.msra.mxu1 %v447_v4 }
 0x141   :  { %719 = vmatprep.subr.mxu1 %v831_v0 }
 0x142   :  { %720 = vmatpush3.msra.mxu1 %v446_v5 }
 0x143   :  { %721 = vmatprep.subr.mxu1 %v831_v0 }
 0x144   :  { %722 = vmatpush3.msra.mxu1 %v445_v6 }
 0x1e5   :  { %v259_v14 = vpop.f32.mrf.mxu1 }
 0x1e6   :  { %vm263_vm3 = vcmp.ge.f32.partialorder %v259_v14, 0.0  ;;  %v264_v15 = vmul.f32 0.01, %v259_v14 }
 0x1e7   :  { %v655_v16 = vpop.f32.mrf.mxu1 }
 0x1e8   :  { %v265_v17 = vsel %vm263_vm3, %v259_v14, %v264_v15 }
 0x1e9   :  { %v269_v18 = vrot.slane %v265_v17, %v894_v25 }
 0x1eb   :  { %v270_v19 = vsub.f32 %v265_v17, %v269_v18 }
 0x1ed   :  { %v271_v20 = vrot.slane %v270_v19, 4  ;;  %v277_v21 = vmul.f32 %v270_v19, %v270_v19 }
 0x1ef   :  { %v272_v22 = vadd.f32 %v271_v20, %v270_v19  ;;  %v278_v24 = vrot.slane %v277_v21, 4 }
 0x1f1   :  { %v273_v26 = vrot.slane %v272_v22, 2  ;;  %v279_v27 = vadd.f32 %v278_v24, %v277_v21 }
 0x1f3   :  { %v274_v28 = vadd.f32 %v273_v26, %v272_v22  ;;  %v280_v29 = vrot.slane %v279_v27, 2 }
 0x1f5   :  { %v275_v30 = vrot.slane %v274_v28, 1  ;;  %v281_v31 = vadd.f32 %v280_v29, %v279_v27 }
 0x1f7   :  { %v276_v32 = vadd.f32 %v275_v30, %v274_v28  ;;  %v282_v33 = vrot.slane %v281_v31, 1 }
 0x1f9   :  { %v283_v34 = vadd.f32 %v282_v33, %v281_v31  ;;  %v284_v35 = vmul.f32 0.125, %v276_v32 }
 0x1fb   :  { %v285_v36 = vmul.f32 0.125, %v283_v34  ;;  %v286_v37 = vmul.f32 %v284_v35, %v284_v35  ;;  %v291_v42 = vadd.f32 %v284_v35, %v265_v17  ;;  %v436_v35 = vsub.s32 4, %v891_v23 }
 0x1fd   :  { %v287_v38 = vsub.f32 %v285_v36, %v286_v37 }
 0x1ff   :  { %v288_v39 = vadd.f32 1e-05, %v287_v38 }
 0x201   :  { %736 = vrsqrt.f32 %v288_v39  ;;  %v441_v39 = vsub.s32 5, %v891_v23 }
 0x20e   :  { %v737_v40 = vpop.eup %736 }
 0x20f   :  { %v290_v41 = vmul.f32 %v737_v40, %v897_v49 }
 0x211   :  { %v293_v43 = vrot.slane %v290_v41, 2  ;;  %v303_v47 = vrot.slane %v290_v41, %v302_v44  ;;  %v463_v44 = vsub.s32 6, %v891_v23 }
 0x213   :  { %v295_v45 = vmul.f32 %v293_v43, %v291_v42  ;;  %v304_v51 = vmul.f32 %v303_v47, %v265_v17 }
 0x215   :  { %v297_v46 = vrot.slane %v295_v45, 5  ;;  %v464_v45 = vrot.slane %v897_v49, %v463_v44 }
 0x217   :  { %v299_v50 = vsub.f32 %v897_v49, %v297_v46 }
 0x219   :  { %v308_v52 = vrot.slane %v299_v50, %v307_v48 }
 0x21b   :  { %v309_v53 = vadd.f32 %v308_v52, %v304_v51 }
 0x21d   :  { %689 = vmatmul.mubr.f32.vlgmr.msra.gmra.mxu0 %v309_v53 }
 0x2dd   :  { %v393_v7 = vpop.f32.mrf.mxu0 }
 0x2de   :  { %vm397_vm4 = vcmp.ge.f32.partialorder %v393_v7, 0.0  ;;  %v398_v8 = vmul.f32 0.01, %v393_v7 }
 0x2df   :  { %v690_v9 = vpop.f32.mrf.mxu0 }
 0x2e0   :  { %v399_v10 = vsel %vm397_vm4, %v393_v7, %v398_v8 }
 0x2e1   :  { %v403_v11 = vrot.slane %v399_v10, %v894_v25 }
 0x2e3   :  { %v404_v12 = vsub.f32 %v399_v10, %v403_v11 }
 0x2e5   :  { %v405_v13 = vrot.slane %v404_v12, 4  ;;  %v411_v14 = vmul.f32 %v404_v12, %v404_v12 }
 0x2e7   :  { %v406_v15 = vadd.f32 %v405_v13, %v404_v12  ;;  %v412_v16 = vrot.slane %v411_v14, 4 }
 0x2e9   :  { %v407_v17 = vrot.slane %v406_v15, 2  ;;  %v413_v18 = vadd.f32 %v412_v16, %v411_v14 }
 0x2eb   :  { %v408_v19 = vadd.f32 %v407_v17, %v406_v15  ;;  %v414_v20 = vrot.slane %v413_v18, 2 }
 0x2ed   :  { %v409_v21 = vrot.slane %v408_v19, 1  ;;  %v415_v22 = vadd.f32 %v414_v20, %v413_v18 }
 0x2ef   :  { %v410_v0 = vadd.f32 %v409_v21, %v408_v19  ;;  %v416_v24 = vrot.slane %v415_v22, 1 }
 0x2f1   :  { %v417_v26 = vadd.f32 %v416_v24, %v415_v22  ;;  %v418_v27 = vmul.f32 0.125, %v410_v0 }
 0x2f3   :  { %v419_v28 = vmul.f32 0.125, %v417_v26  ;;  %v420_v29 = vmul.f32 %v418_v27, %v418_v27  ;;  %v425_v33 = vadd.f32 %v418_v27, %v399_v10 }
 0x2f5   :  { %v421_v30 = vsub.f32 %v419_v28, %v420_v29 }
 0x2f7   :  { %v422_v31 = vadd.f32 1e-05, %v421_v30 }
 0x2f9   :  { %738 = vrsqrt.f32 %v422_v31 }
 0x306   :  { %v739_v25 = vpop.eup %738 }
 0x307   :  { %v424_v32 = vmul.f32 %v739_v25, %v897_v49 }
 0x309   :  { %v427_v34 = vrot.slane %v424_v32, 4  ;;  %v437_v38 = vrot.slane %v424_v32, %v436_v35 }
 0x30b   :  { %v429_v36 = vmul.f32 %v427_v34, %v425_v33  ;;  %v438_v41 = vmul.f32 %v437_v38, %v399_v10 }
 0x30d   :  { %v431_v37 = vrot.slane %v429_v36, 3 }
 0x30f   :  { %v433_v40 = vsub.f32 %v897_v49, %v431_v37 }
 0x311   :  { %v442_v42 = vrot.slane %v433_v40, %v441_v39 }
 0x313   :  { %v443_v43 = vadd.f32 %v442_v42, %v438_v41 }
 0x315   :  { %724 = vmatmul.mubr.f32.vlgmr.msra.gmra.mxu1 %v443_v43 }
 0x3d5   :  { %v531_v46 = vpop.f32.mrf.mxu1 }
 0x3d6   :  { %v532_v47 = vadd.f32 %v531_v46, %v464_v45 }
 0x3d7   :  { %v725_v48 = vpop.f32.mrf.mxu1 }
 0x3d8   :  { %536 = vst.msk [vmem:[#allocation8] sm:$0xff] %vm535_vm5, %v532_v47 }
 0x3d9   :  { %811 = shalt.err (!%p808_p5)
}
 0x3da   :  { %546 = dma.vmem_to_hbm [thread:$0]  %s544_s2, 128, %s953_s3, [#allocation4]  }
 0x3db   :  { %824 = dma.done.wait [#allocation4], 128  }
 0x3dc   :  { %825 = vsyncadd [#allocation4], 4294967168 }
 0x3dd   :  { %550 = vsyncpa [#allocation3], 1 }
 0x3de   :  { %551 = vsyncpa [#allocation6], 1 }
 0x3df   :  { %552 = vsyncpa [#allocation4], 1 }

</bundles_post_ra>
